<compile_context>
chip_gen: v5e
topology: v5e:2x2
jax: 0.10.0
libtpu: 0.0.40
codegen_flags: <defaults>
</compile_context>

<pallas_src>
import functools

import jax
import jax.numpy as jnp
from jax.experimental import pallas as pl
from jax.experimental.pallas import tpu as pltpu

_LANES = 128
_SUBLANES = 8


def _sigmoid(x):
    # Single EUP op (tanh); mathematically identical to sigmoid.
    half = jnp.asarray(0.5, x.dtype)
    return half * jnp.tanh(half * x) + half


def _soft_dice_kernel(x_ref, y_ref, numer_ref, denor_ref, *,
                      p, d_total, tile_r, needs_mask, compute_dtype):
    k = pl.program_id(1)              # reduction (row-block) axis, innermost
    nk = pl.num_programs(1)

    @pl.when(k == 0)
    def _():
        numer_ref[...] = jnp.zeros_like(numer_ref)
        denor_ref[...] = jnp.zeros_like(denor_ref)

    x = x_ref[...].astype(compute_dtype)          # (tile_n, tile_r, 128)
    y = y_ref[...].astype(compute_dtype)

    probs = _sigmoid(x)
    numer_c = probs * y
    if p == 1:                                    # pow(1) is identity
        denor_c = probs + y
    elif p == 2:
        denor_c = probs * probs + y * y
    else:                                         # generic pow
        denor_c = probs ** p + y ** p

    def accumulate(n_c, d_c, mask):
        # Partial sums always accumulate in f32 (even on the bf16 path).
        nf = n_c.astype(jnp.float32)
        df = d_c.astype(jnp.float32)
        if mask is not None:
            # Select-form masking: neutralizes garbage (NaN/Inf) OOB rows and
            # the zero-padded ragged tail.
            nf = jnp.where(mask, nf, 0.0)
            df = jnp.where(mask, df, 0.0)
        numer_ref[...] += jnp.sum(nf, axis=1, keepdims=True)   # (tile_n,1,128)
        denor_ref[...] += jnp.sum(df, axis=1, keepdims=True)

    if needs_mask:
        # Only the final k block pays the iota/compare/select cost.
        @pl.when(k < nk - 1)
        def _():
            accumulate(numer_c, denor_c, None)

        @pl.when(k == nk - 1)
        def _():
            rows = jax.lax.broadcasted_iota(jnp.int32, numer_c.shape, 1)
            lanes = jax.lax.broadcasted_iota(jnp.int32, numer_c.shape, 2)
            flat = (k * tile_r + rows) * _LANES + lanes
            accumulate(numer_c, denor_c, flat < d_total)
    else:
        accumulate(numer_c, denor_c, None)


def _default_tuning():
    """(target_block_bytes, vmem_limit_bytes), generation-gated."""
    try:
        kind = jax.devices()[0].device_kind.lower()
    except Exception:
        kind = ""
    if "v5" in kind or "v6" in kind:
        # 128 MiB physical VMEM, HBM-bound -> bigger blocks / higher limit.
        return 4 * 1024 * 1024, 64 * 1024 * 1024
    # v7x (64 MiB physical) and unknown chips: conservative.
    return 2 * 1024 * 1024, 32 * 1024 * 1024


def _choose_tiles(N, R, target_block_bytes):
    # Row budget is sized against the f32 temporaries the kernel materializes
    # (independent of the, possibly narrower, input dtype).
    max_rows = max(_SUBLANES,
                   (target_block_bytes // (_LANES * 4))
                   // _SUBLANES * _SUBLANES)
    if R <= max_rows:
        # Whole per-sample reduction fits in one block: batch samples instead.
        tile_r = R
        tile_n = max(1, min(N, max_rows // max(R, 1), 1024))
    else:
        tile_n = 1
        # Prefer a multiple-of-8 tile_r that divides R -> no masking at all.
        tile_r = 0
        cand = max_rows
        lo = max(_SUBLANES, max_rows // 2)
        while cand >= lo:
            if R % cand == 0:
                tile_r = cand
                break
            cand -= _SUBLANES
        if tile_r == 0:
            tile_r = max_rows        # masked last block only
    return tile_n, tile_r


def soft_dice_loss(logits, labels, p=1, smooth=1.0,
                   target_block_bytes=None, vmem_limit_bytes=None):
    """logits, labels: (N, H, W, ...) -> per-sample loss of shape (N,), f32.

    Inputs are NOT up-cast on the host; the cast happens in-kernel, so callers
    should keep logits bf16 / labels int8/bool where possible to cut HBM bytes
    (v5e/v6e are HBM-bound).
    """
    N = logits.shape[0]
    x = logits.reshape(N, -1)   # free reshape, native dtype stays in HBM
    y = labels.reshape(N, -1)
    D = x.shape[1]
    if D == 0:
        return jnp.zeros((N,), jnp.float32)

    default_blk, default_vmem = _default_tuning()
    if target_block_bytes is None:
        target_block_bytes = default_blk
    if vmem_limit_bytes is None:
        vmem_limit_bytes = default_vmem

    # Ragged D: pad once to a multiple of 128 and fold the tail into the
    # masked last block (no slice copies, no separate unfused tail pass).
    D_pad = pl.cdiv(D, _LANES) * _LANES
    if D_pad != D:
        x = jnp.pad(x, ((0, 0), (0, D_pad - D)))
        y = jnp.pad(y, ((0, 0), (0, D_pad - D)))
    R = D_pad // _LANES
    x3 = x.reshape(N, R, _LANES)   # free reshape of contiguous data
    y3 = y.reshape(N, R, _LANES)

    tile_n, tile_r = _choose_tiles(N, R, target_block_bytes)
    num_n_blocks = pl.cdiv(N, tile_n)
    num_k_blocks = pl.cdiv(R, tile_r)
    needs_mask = (D_pad != D) or (R % tile_r != 0)

    # bf16 inputs: keep sigmoid/products in bf16 (packed EUP/VPU on v6e/v7x);
    # accumulation stays f32 inside the kernel.
    compute_dtype = (jnp.bfloat16 if jnp.dtype(logits.dtype) == jnp.bfloat16
                     else jnp.float32)

    kernel = functools.partial(
        _soft_dice_kernel, p=p, d_total=D, tile_r=tile_r,
        needs_mask=needs_mask, compute_dtype=compute_dtype)

    numer_l, denor_l = pl.pallas_call(
        kernel,
        out_shape=(jax.ShapeDtypeStruct((N, 1, _LANES), jnp.float32),
                   jax.ShapeDtypeStruct((N, 1, _LANES), jnp.float32)),
        grid_spec=pltpu.PrefetchScalarGridSpec(
            num_scalar_prefetch=0,
            grid=(num_n_blocks, num_k_blocks),
            in_specs=[
                pl.BlockSpec((tile_n, tile_r, _LANES), lambda n, k: (n, k, 0)),
                pl.BlockSpec((tile_n, tile_r, _LANES), lambda n, k: (n, k, 0)),
            ],
            out_specs=[
                pl.BlockSpec((tile_n, 1, _LANES), lambda n, k: (n, 0, 0)),
                pl.BlockSpec((tile_n, 1, _LANES), lambda n, k: (n, 0, 0)),
            ],
        ),
        compiler_params=pltpu.CompilerParams(
            dimension_semantics=("parallel", "arbitrary"),
            vmem_limit_bytes=vmem_limit_bytes,
        ),
    )(x3, y3)

    # Tiny final combine on (N, 128) lane-wise partials.
    numer = numer_l.sum(axis=(1, 2))
    denor = denor_l.sum(axis=(1, 2))
    return 1.0 - (2.0 * numer + float(smooth)) / (denor + float(smooth))


def soft_dice_loss_ref(logits, labels, p=1, smooth=1.0):
    N = logits.shape[0]
    probs = jax.nn.sigmoid(logits.astype(jnp.float32))
    labels = labels.astype(jnp.float32)
    numer = (probs * labels).reshape(N, -1).sum(1)
    denor = (probs ** p + labels ** p).reshape(N, -1).sum(1)
    return 1.0 - (2.0 * numer + smooth) / (denor + smooth)


if __name__ == "__main__":
    root = jax.random.PRNGKey(0)

    def run_case(seed, shape, dtype, p, smooth, atol, rtol, **kwargs):
        k1, k2 = jax.random.split(jax.random.fold_in(root, seed))
        logits = jax.random.normal(k1, shape, dtype=jnp.float32).astype(dtype)
        labels = (jax.random.uniform(k2, shape) > 0.5).astype(dtype)
        loss = jax.block_until_ready(
            soft_dice_loss(logits, labels, p=p, smooth=smooth, **kwargs))
        ref = soft_dice_loss_ref(logits, labels, p=p, smooth=smooth)
        assert loss.shape == (shape[0],), (loss.shape, shape)
        assert jnp.allclose(loss, ref, atol=atol, rtol=rtol), \
            (shape, dtype, loss, ref)

    # Primary module-sized case: N=2, 16x16, f32, p=1 (single block, tile_n=2).
    run_case(0, (2, 16, 16), jnp.float32, 1, 1.0, 1e-5, 1e-5)
    # R multiple of 8, p=2 branch.
    run_case(1, (2, 32, 32), jnp.float32, 2, 1.0, 1e-5, 1e-5)
    # Multi-block reduction axis (tiny block budget), tile_r divides R -> no mask.
    run_case(2, (2, 5120), jnp.float32, 1, 1.0, 1e-5, 1e-5,
             target_block_bytes=8192)
    # Ragged D + partial last row-block -> masked-tail pl.when path.
    run_case(3, (2, 2600), jnp.float32, 1, 1.0, 1e-5, 1e-5,
             target_block_bytes=8192)
    # bf16 inputs: bf16 compute path (f32 accumulation), ragged D.
    run_case(4, (2, 40, 40), jnp.bfloat16, 1, 1.0, 3e-2, 3e-2)

    print("KERNEL_OK")
</pallas_src>

<mosaic_0001>
module attributes {stable_mosaic.version = 11 : i64} {
  func.func @_soft_dice_kernel(%arg0: i32, %arg1: i32, %arg2: memref<2x2x128xf32, #tpu.memory_space<vmem>>, %arg3: memref<2x2x128xf32, #tpu.memory_space<vmem>>, %arg4: memref<2x1x128xf32, #tpu.memory_space<vmem>>, %arg5: memref<2x1x128xf32, #tpu.memory_space<vmem>>) attributes {dimension_semantics = [#tpu.dimension_semantics<parallel>, #tpu.dimension_semantics<arbitrary>], iteration_bounds = array<i64: 1, 1>, scalar_prefetch = 0 : i64, scratch_operands = 0 : i64, tpu.core_type = #tpu.core_type<tc>, window_params = [{transform_indices = @transform_0, window_bounds = array<i64: 2, 2, 128>}, {transform_indices = @transform_1, window_bounds = array<i64: 2, 2, 128>}, {transform_indices = @transform_2, window_bounds = array<i64: 2, 1, 128>}, {transform_indices = @transform_3, window_bounds = array<i64: 2, 1, 128>}]} {
    %c0_i32 = arith.constant 0 : i32
    %0 = arith.cmpi eq, %arg1, %c0_i32 : i32
    %1 = arith.extui %0 : i1 to i32
    %c0_i32_0 = arith.constant 0 : i32
    %2 = arith.cmpi ne, %1, %c0_i32_0 : i32
    scf.if %2 {
      %cst_22 = arith.constant 0.000000e+00 : f32
      %24 = vector.broadcast %cst_22 : f32 to vector<2x1x128xf32>
      %c0_23 = arith.constant 0 : index
      %c0_24 = arith.constant 0 : index
      %c0_25 = arith.constant 0 : index
      %25 = vector.load %arg4[%c0_23, %c0_24, %c0_25] : memref<2x1x128xf32, #tpu.memory_space<vmem>>, vector<2x1x128xf32>
      tpu.vector_store %arg4[%c0_23, %c0_24, %c0_25], %24 {strides = array<i32>} : memref<2x1x128xf32, #tpu.memory_space<vmem>>, vector<2x1x128xf32>,
      %cst_26 = arith.constant 0.000000e+00 : f32
      %26 = vector.broadcast %cst_26 : f32 to vector<2x1x128xf32>
      %c0_27 = arith.constant 0 : index
      %c0_28 = arith.constant 0 : index
      %c0_29 = arith.constant 0 : index
      %27 = vector.load %arg5[%c0_27, %c0_28, %c0_29] : memref<2x1x128xf32, #tpu.memory_space<vmem>>, vector<2x1x128xf32>
      tpu.vector_store %arg5[%c0_27, %c0_28, %c0_29], %26 {strides = array<i32>} : memref<2x1x128xf32, #tpu.memory_space<vmem>>, vector<2x1x128xf32>,
    } else {
    }
    %c0 = arith.constant 0 : index
    %c0_1 = arith.constant 0 : index
    %c0_2 = arith.constant 0 : index
    %3 = vector.load %arg2[%c0, %c0_1, %c0_2] : memref<2x2x128xf32, #tpu.memory_space<vmem>>, vector<2x2x128xf32>
    %c0_3 = arith.constant 0 : index
    %c0_4 = arith.constant 0 : index
    %c0_5 = arith.constant 0 : index
    %4 = vector.load %arg3[%c0_3, %c0_4, %c0_5] : memref<2x2x128xf32, #tpu.memory_space<vmem>>, vector<2x2x128xf32>
    %cst = arith.constant 5.000000e-01 : f32
    %5 = vector.broadcast %cst : f32 to vector<2x2x128xf32>
    %6 = arith.mulf %5, %3 : vector<2x2x128xf32>
    %7 = math.tanh %6 : vector<2x2x128xf32>
    %cst_6 = arith.constant 5.000000e-01 : f32
    %8 = vector.broadcast %cst_6 : f32 to vector<2x2x128xf32>
    %9 = arith.mulf %8, %7 : vector<2x2x128xf32>
    %cst_7 = arith.constant 5.000000e-01 : f32
    %10 = vector.broadcast %cst_7 : f32 to vector<2x2x128xf32>
    %11 = arith.addf %9, %10 : vector<2x2x128xf32>
    %12 = arith.mulf %11, %4 : vector<2x2x128xf32>
    %13 = arith.addf %11, %4 : vector<2x2x128xf32>
    %c0_8 = arith.constant 0 : index
    %c0_9 = arith.constant 0 : index
    %c0_10 = arith.constant 0 : index
    %14 = vector.load %arg4[%c0_8, %c0_9, %c0_10] : memref<2x1x128xf32, #tpu.memory_space<vmem>>, vector<2x1x128xf32>
    %cst_11 = arith.constant dense<0.000000e+00> : vector<2x128xf32>
    %15 = vector.multi_reduction <add>, %12, %cst_11 [1] : vector<2x2x128xf32> to vector<2x128xf32>
    %16 = vector.shape_cast %15 : vector<2x128xf32> to vector<2x1x128xf32>
    %17 = arith.addf %14, %16 : vector<2x1x128xf32>
    %c0_12 = arith.constant 0 : index
    %c0_13 = arith.constant 0 : index
    %c0_14 = arith.constant 0 : index
    %18 = vector.load %arg4[%c0_12, %c0_13, %c0_14] : memref<2x1x128xf32, #tpu.memory_space<vmem>>, vector<2x1x128xf32>
    tpu.vector_store %arg4[%c0_12, %c0_13, %c0_14], %17 {strides = array<i32>} : memref<2x1x128xf32, #tpu.memory_space<vmem>>, vector<2x1x128xf32>,
    %c0_15 = arith.constant 0 : index
    %c0_16 = arith.constant 0 : index
    %c0_17 = arith.constant 0 : index
    %19 = vector.load %arg5[%c0_15, %c0_16, %c0_17] : memref<2x1x128xf32, #tpu.memory_space<vmem>>, vector<2x1x128xf32>
    %cst_18 = arith.constant dense<0.000000e+00> : vector<2x128xf32>
    %20 = vector.multi_reduction <add>, %13, %cst_18 [1] : vector<2x2x128xf32> to vector<2x128xf32>
    %21 = vector.shape_cast %20 : vector<2x128xf32> to vector<2x1x128xf32>
    %22 = arith.addf %19, %21 : vector<2x1x128xf32>
    %c0_19 = arith.constant 0 : index
    %c0_20 = arith.constant 0 : index
    %c0_21 = arith.constant 0 : index
    %23 = vector.load %arg5[%c0_19, %c0_20, %c0_21] : memref<2x1x128xf32, #tpu.memory_space<vmem>>, vector<2x1x128xf32>
    tpu.vector_store %arg5[%c0_19, %c0_20, %c0_21], %22 {strides = array<i32>} : memref<2x1x128xf32, #tpu.memory_space<vmem>>, vector<2x1x128xf32>,
    return
  }
  func.func @transform_0(%arg0: i32, %arg1: i32) -> (i32, i32, i32) {
    %c0_i32 = arith.constant 0 : i32
    %c0_i32_0 = arith.constant 0 : i32
    return %arg0, %arg1, %c0_i32 : i32, i32, i32
  }
  func.func @transform_1(%arg0: i32, %arg1: i32) -> (i32, i32, i32) {
    %c0_i32 = arith.constant 0 : i32
    %c0_i32_0 = arith.constant 0 : i32
    return %arg0, %arg1, %c0_i32 : i32, i32, i32
  }
  func.func @transform_2(%arg0: i32, %arg1: i32) -> (i32, i32, i32) {
    %c0_i32 = arith.constant 0 : i32
    %c0_i32_0 = arith.constant 0 : i32
    %c0_i32_1 = arith.constant 0 : i32
    return %arg0, %c0_i32, %c0_i32_0 : i32, i32, i32
  }
  func.func @transform_3(%arg0: i32, %arg1: i32) -> (i32, i32, i32) {
    %c0_i32 = arith.constant 0 : i32
    %c0_i32_0 = arith.constant 0 : i32
    %c0_i32_1 = arith.constant 0 : i32
    return %arg0, %c0_i32, %c0_i32_0 : i32, i32, i32
  }
}

</mosaic_0001>

<bundles_post_ra>
// kernel: tpu_custom_call.1
= control target key start
LH: loop header
LB: loop body
LE: loop exit
PB: predicated region body
PF: predicated region fallthrough
CT: control target
= control target key end

     0   :  { %9 = vsyncpa [#allocation3], 0  ;;  %s311_s0 = inlined_call_operand.hbm [shape: f32[2,2,128], index: 0, kind: input, shape index: {}]   ;;  %s312_s1 = inlined_call_operand.hbm [shape: f32[2,2,128], index: 1, kind: input, shape index: {}]   ;;  %s313_s2 = inlined_call_operand.hbm [shape: f32[2,1,128], index: 2, kind: output, shape index: {0}]   ;;  %s314_s3 = inlined_call_operand.hbm [shape: f32[2,1,128], index: 3, kind: output, shape index: {1}]  }
   0x1   :  { %10 = vsyncpa [#allocation6], 0 }
   0x2   :  { %11 = vsyncpa [#allocation4], 0 }
   0x3   :  { %12 = vsyncpa [#allocation9], 0  ;;  %s17_s14 = sshll.u32 %s311_s0, 4  ;;  %s267_s15 = smov [#allocation2]   ;;  %s18_s14 = int_to_ptr.hbm [resolvable:$true] %s17_s14 }
   0x4   :  { %s19_s16 = sshll.u32 %s267_s15, 4  ;;  %s30_s19 = sshll.u32 %s312_s1, 4  ;;  %s20_s16 = int_to_ptr.vmem [resolvable:$true] %s19_s16  ;;  %s31_s19 = int_to_ptr.hbm [resolvable:$true] %s30_s19 }
   0x5   :  { %s268_s20 = smov 32   ;;  %s269_s21 = smov 2  }
   0x6   :  { %25 = dma.hbm_to_vmem [thread:$0]  %s18_s14, 64, %s20_s16, [#allocation3], %s268_s20, %s268_s20, %s269_s21  }
   0x7   :  { %s270_s22 = smov [#allocation5]  }
   0x8   :  { %s32_s23 = sshll.u32 %s270_s22, 4  ;;  %s33_s23 = int_to_ptr.vmem [resolvable:$true] %s32_s23 }
   0x9   :  { %38 = dma.hbm_to_vmem [thread:$0]  %s31_s19, 64, %s33_s23, [#allocation6], %s268_s20, %s268_s20, %s269_s21  }
   0xa   :  { %259 = dma.done.wait [#allocation3], 64  }
   0xb   :  { %260 = vsyncadd [#allocation3], 4294967232 }
   0xc   :  { %261 = dma.done.wait [#allocation6], 64  }
   0xd   :  { %262 = vsyncadd [#allocation6], 4294967232  ;;  %v271_v0 = vmov 0.0   ;;  %v55_v1 = vld [vmem:[#allocation2] sm:$0x3]  ;;  %vm73_vm0 = vcmask 1041408  }
   0xe   :  { %51 = vst [vmem:[#allocation7] sm:$0x1] %v271_v0  ;;  %v56_v2 = vld [vmem:[#allocation2 + $0x2] sm:$0x3]  ;;  %v59_v3 = vmul.f32 0.5, %v55_v1  ;;  %s118_s24 = sshll.u32 %s313_s2, 4  ;;  %s119_s24 = int_to_ptr.hbm [resolvable:$true] %s118_s24 }
   0xf   :  { %52 = vst [vmem:[#allocation7 + $0x1] sm:$0x1] %v271_v0  ;;  %v60_v4 = vmul.f32 0.5, %v56_v2  ;;  %v57_v8 = vld [vmem:[#allocation5] sm:$0x3]  ;;  %s272_s25 = smov [#allocation7]  }
  0x10   :  { %53 = vst [vmem:[#allocation8] sm:$0x1] %v271_v0  ;;  %159 = vtanh.f32 %v59_v3  ;;  %v58_v11 = vld [vmem:[#allocation5 + $0x2] sm:$0x3]  ;;  %s305_s26 = sshll.u32 %s272_s25, 4  ;;  %s273_s2 = smov [#allocation8]   ;;  %s117_s26 = int_to_ptr.vmem [resolvable:$true] %s305_s26 }
  0x11   :  { %54 = vst [vmem:[#allocation8 + $0x1] sm:$0x1] %v271_v0  ;;  %161 = vtanh.f32 %v60_v4  ;;  %s129_s27 = sshll.u32 %s273_s2, 4  ;;  %s131_s30 = sshll.u32 %s314_s3, 4  ;;  %s130_s27 = int_to_ptr.vmem [resolvable:$true] %s129_s27  ;;  %s132_s30 = int_to_ptr.hbm [resolvable:$true] %s131_s30 }
  0x12   :  { %s274_s4 = smov 16   ;;  %s275_s5 = smov 1  }
  0x15   :  { %v71_v39 = vld [vmem:[#allocation7] sm:$0x1] }
  0x16   :  { %v160_v5 = vpop.eup %159  ;;  %v72_v44 = vld [vmem:[#allocation7 + $0x1] sm:$0x1] }
  0x17   :  { %v162_v6 = vpop.eup %161  ;;  %v63_v7 = vmul.f32 0.5, %v160_v5  ;;  %v92_v41 = vld [vmem:[#allocation8] sm:$0x1] }
  0x18   :  { %v64_v9 = vmul.f32 0.5, %v162_v6  ;;  %v93_v46 = vld [vmem:[#allocation8 + $0x1] sm:$0x1] }
  0x19   :  { %v65_v10 = vadd.f32 0.5, %v63_v7 }
  0x1a   :  { %v66_v12 = vadd.f32 0.5, %v64_v9 }
  0x1b   :  { %v67_v13 = vmul.f32 %v65_v10, %v57_v8  ;;  %v69_v14 = vadd.f32 %v65_v10, %v57_v8 }
  0x1c   :  { %v68_v15 = vmul.f32 %v66_v12, %v58_v11  ;;  %v70_v16 = vadd.f32 %v66_v12, %v58_v11 }
  0x1d   :  { %v74_v17 = vsel %vm73_vm0, %v67_v13, 0.0  ;;  %v94_v18 = vsel %vm73_vm0, %v69_v14, 0.0 }
  0x1e   :  { %v75_v19 = vrot.slane %v74_v17, 4  ;;  %v81_v20 = vsel %vm73_vm0, %v68_v15, 0.0  ;;  %v95_v21 = vrot.slane %v94_v18, 4  ;;  %v101_v22 = vsel %vm73_vm0, %v70_v16, 0.0 }
  0x1f   :  { %v82_v23 = vrot.slane %v81_v20, 4  ;;  %v102_v24 = vrot.slane %v101_v22, 4 }
  0x20   :  { %v76_v25 = vadd.f32 %v75_v19, %v74_v17  ;;  %v96_v26 = vadd.f32 %v95_v21, %v94_v18 }
  0x21   :  { %v83_v27 = vadd.f32 %v82_v23, %v81_v20  ;;  %v103_v28 = vadd.f32 %v102_v24, %v101_v22 }
  0x22   :  { %v77_v29 = vrot.slane %v76_v25, 2  ;;  %v97_v30 = vrot.slane %v96_v26, 2 }
  0x23   :  { %v84_v31 = vrot.slane %v83_v27, 2  ;;  %v104_v32 = vrot.slane %v103_v28, 2 }
  0x24   :  { %v78_v33 = vadd.f32 %v77_v29, %v76_v25  ;;  %v98_v34 = vadd.f32 %v97_v30, %v96_v26 }
  0x25   :  { %v85_v35 = vadd.f32 %v84_v31, %v83_v27  ;;  %v105_v36 = vadd.f32 %v104_v32, %v103_v28 }
  0x26   :  { %v79_v37 = vrot.slane %v78_v33, 1  ;;  %v99_v38 = vrot.slane %v98_v34, 1 }
  0x27   :  { %v86_v40 = vrot.slane %v85_v35, 1  ;;  %v106_v42 = vrot.slane %v105_v36, 1 }
  0x28   :  { %v80_v43 = vadd.f32 %v79_v37, %v78_v33  ;;  %v100_v45 = vadd.f32 %v99_v38, %v98_v34 }
  0x29   :  { %v87_v47 = vadd.f32 %v86_v40, %v85_v35  ;;  %v107_v48 = vadd.f32 %v106_v42, %v105_v36 }
  0x2a   :  { %v88_v49 = vadd.f32 %v80_v43, %v71_v39  ;;  %v108_v50 = vadd.f32 %v100_v45, %v92_v41 }
  0x2b   :  { %v89_v51 = vadd.f32 %v87_v47, %v72_v44  ;;  %v109_v52 = vadd.f32 %v107_v48, %v93_v46 }
  0x2c   :  { %90 = vst [vmem:[#allocation7] sm:$0x1] %v88_v49 }
  0x2d   :  { %91 = vst [vmem:[#allocation7 + $0x1] sm:$0x1] %v89_v51 }
  0x2e   :  { %110 = vst [vmem:[#allocation8] sm:$0x1] %v108_v50  ;;  %124 = dma.vmem_to_hbm [thread:$0]  %s117_s26, 32, %s119_s24, [#allocation4], %s274_s4, %s274_s4, %s275_s5  }
  0x2f   :  { %111 = vst [vmem:[#allocation8 + $0x1] sm:$0x1] %v109_v52 }
  0x30   :  { %137 = dma.vmem_to_hbm [thread:$0]  %s130_s27, 32, %s132_s30, [#allocation9], %s274_s4, %s274_s4, %s275_s5  }
  0x31   :  { %263 = dma.done.wait [#allocation4], 32  }
  0x32   :  { %264 = vsyncadd [#allocation4], 4294967264 }
  0x33   :  { %265 = dma.done.wait [#allocation9], 32  }
  0x34   :  { %266 = vsyncadd [#allocation9], 4294967264 }
  0x35   :  { %146 = vsyncpa [#allocation3], 1 }
  0x36   :  { %147 = vsyncpa [#allocation6], 1 }
  0x37   :  { %148 = vsyncpa [#allocation4], 1 }
  0x38   :  { %149 = vsyncpa [#allocation9], 1 }

</bundles_post_ra>
